<compile_context>
chip_gen: v7x
topology: tpu7x:2x2x1
jax: 0.10.0
libtpu: 0.0.40
codegen_flags: <defaults>
</compile_context>

<pallas_src>
import functools

import jax
import jax.numpy as jnp
from jax.experimental import pallas as pl
from jax.experimental.pallas import tpu as pltpu


def _round_up(x, m):
    return (x + m - 1) // m * m


def _vq_kernel(z_ref, ed_ref, et_ref, esq_ref, zq_ref, sse_ref,
               *, valid_hw, tile_hw, chunk, k_pad, d_dim):
    """One (n, spatial-tile) grid step.

    z_ref   : (D, tile_hw)  activations tile (spatial axis on lanes)
    ed_ref  : (Kp, D)       -2 * codebook (distance matmul operand)
    et_ref  : (D, Kp)       codebook, transposed (gather operand)
    esq_ref : (Kp, 1)       |e_k|^2, padded rows = +inf
    zq_ref  : (D, tile_hw)  quantized output tile (lane-dense stores)
    sse_ref : (8, 128)      per-tile partial sum of squared errors
    """
    j = pl.program_id(1)

    e_d = ed_ref[...]                                            # (Kp, D)
    e_t = et_ref[...]                                            # (D, Kp)
    e_sq = esq_ref[...]                                          # (Kp, 1)
    k_iota = jax.lax.broadcasted_iota(jnp.int32, (k_pad, 1), 0)  # (Kp, 1)

    num_chunks = tile_hw // chunk

    def body(c, sse_acc):
        start = pl.multiple_of(c * chunk, chunk)
        z = z_ref[:, pl.ds(start, chunk)].astype(jnp.float32)    # (D, chunk)

        # -2 * e . z : MXU for realistic D, VPU broadcast-FMA for tiny D.
        if d_dim <= 8:
            dot = e_d[:, 0:1] * z[0:1, :]
            for d in range(1, d_dim):
                dot = dot + e_d[:, d:d + 1] * z[d:d + 1, :]      # (Kp, chunk)
        else:
            dot = jnp.dot(e_d, z, preferred_element_type=jnp.float32)

        # argmin_k |z - e_k|^2 == argmin_k (|e_k|^2 - 2 e_k.z); |z|^2 is
        # constant per column so it is dropped from the argmin.
        dist = dot + e_sq                                        # (Kp, chunk)
        min_val = jnp.min(dist, axis=0, keepdims=True)           # (1, chunk)
        is_min = dist <= min_val
        min_idx = jnp.min(jnp.where(is_min, k_iota, k_pad),
                          axis=0, keepdims=True)                 # (1, chunk)

        # Gather the selected code vectors via a one-hot matmul.
        onehot = (k_iota == min_idx).astype(jnp.float32)         # (Kp, chunk)
        z_q = jnp.dot(e_t, onehot,
                      preferred_element_type=jnp.float32)        # (D, chunk)
        zq_ref[:, pl.ds(start, chunk)] = z_q.astype(zq_ref.dtype)

        # Partial SSE; mask the ragged spatial tail (only possible when
        # H*W is not a multiple of the tile).
        diff = z - z_q
        if valid_hw % tile_hw != 0:
            col = (jax.lax.broadcasted_iota(jnp.int32, (1, chunk), 1)
                   + (j * tile_hw + start))
            diff = jnp.where(col < valid_hw, diff, 0.0)
        return sse_acc + jnp.sum(diff * diff)

    sse = jax.lax.fori_loop(0, num_chunks, body, jnp.float32(0.0), unroll=True)
    sse_ref[...] = jnp.broadcast_to(sse, sse_ref.shape)


def _vmem_caps():
    """(physical VMEM bytes, scoped limit we will request)."""
    try:
        cap = int(pltpu.get_tpu_info().vmem_capacity_bytes)
    except Exception:
        cap = 64 << 20  # conservative fallback (v7x-sized)
    limit = min(cap // 2, 64 << 20)   # 64 MiB on v5e/v6e, 32 MiB on v7x
    return cap, limit


@functools.partial(jax.jit, static_argnames=("tile_hw", "chunk"))
def vector_quantizer_forward(z_e, embedding, *, tile_hw=8192, chunk=512):
    """Mirrors VectorQuantizer.forward.

    z_e       : (N, C, H, W) float32, C == embed_dim
    embedding : (num_embeddings, embed_dim) float32 codebook
    returns   : (z_q [N,C,H,W], embedding_loss, commitment_loss)
    """
    N, C, H, W = z_e.shape
    K, D = embedding.shape
    assert C == D, "channel dim must equal embed_dim"
    HW = H * W

    # --- codebook prep (done once, outside the grid) -----------------------
    K_pad = _round_up(K, 8)
    e = embedding.astype(jnp.float32)
    e_sq = jnp.sum(e * e, axis=1, keepdims=True)                 # (K, 1)
    if K_pad != K:
        e = jnp.pad(e, ((0, K_pad - K), (0, 0)))
        e_sq = jnp.pad(e_sq, ((0, K_pad - K), (0, 0)),
                       constant_values=jnp.inf)                  # pad rows never win
    e_dist = -2.0 * e                                            # (K_pad, D)
    e_t = e.T                                                    # (D, K_pad)

    # --- generation-aware tile sizing --------------------------------------
    _, vmem_limit = _vmem_caps()
    budget = vmem_limit - (8 << 20)                              # headroom
    codebook_bytes = 2 * (2 * K_pad * D + K_pad) * 4             # double-buffered
    inter_bytes = 8 * K_pad * max(chunk, 128) * 4                # argmin working set
    col_bytes = 4 * D * 4                                        # z in + z_q out, 2x buffered
    avail = max(budget - codebook_bytes - inter_bytes - (256 << 10),
                col_bytes * 128)
    tm_cap = max(128, (avail // col_bytes) // 128 * 128)
    tm = min(_round_up(tile_hw, 128), tm_cap, _round_up(HW, 128))
    if tm >= chunk:
        tm = tm // chunk * chunk
        ck = chunk
    else:
        ck = tm
    n_hw_tiles = pl.cdiv(HW, tm)

    # --- kernel launch (no transposes / pads: free NCHW -> (N,C,HW) view) --
    z_flat = z_e.reshape(N, C, HW)

    kernel = functools.partial(_vq_kernel, valid_hw=HW, tile_hw=tm,
                               chunk=ck, k_pad=K_pad, d_dim=D)

    zq_flat, sse_parts = pl.pallas_call(
        kernel,
        out_shape=(
            jax.ShapeDtypeStruct((N, C, HW), z_e.dtype),
            jax.ShapeDtypeStruct((N, n_hw_tiles, 8, 128), jnp.float32),
        ),
        grid_spec=pltpu.PrefetchScalarGridSpec(
            num_scalar_prefetch=0,
            grid=(N, n_hw_tiles),
            in_specs=[
                pl.BlockSpec((None, D, tm), lambda n, j: (n, 0, j)),   # z tile
                pl.BlockSpec((K_pad, D), lambda n, j: (0, 0)),         # -2*e
                pl.BlockSpec((D, K_pad), lambda n, j: (0, 0)),         # e^T
                pl.BlockSpec((K_pad, 1), lambda n, j: (0, 0)),         # |e|^2
            ],
            out_specs=[
                pl.BlockSpec((None, D, tm), lambda n, j: (n, 0, j)),   # z_q tile
                pl.BlockSpec((None, None, 8, 128),
                             lambda n, j: (n, j, 0, 0)),               # SSE partial
            ],
        ),
        compiler_params=pltpu.CompilerParams(
            dimension_semantics=("parallel", "parallel"),
            vmem_limit_bytes=vmem_limit,
        ),
    )(z_flat, e_dist, e_t, e_sq)

    z_q = zq_flat.reshape(N, C, H, W)                            # free reshape

    mse = jnp.sum(sse_parts[:, :, 0, 0]) / jnp.float32(N * C * H * W)
    embedding_loss = mse   # F.mse_loss(z_e.detach(), z_q): same value in fwd
    commitment_loss = mse  # F.mse_loss(z_e, z_q.detach()): same value in fwd
    return z_q, embedding_loss, commitment_loss


if __name__ == "__main__":
    num_embeddings = 32
    embed_dim = 4          # == channels
    N, C, H, W = 2, embed_dim, 16, 16

    key = jax.random.PRNGKey(0)
    k_z, k_e = jax.random.split(key)

    z_e = jax.random.normal(k_z, (N, C, H, W), dtype=jnp.float32)
    # nn.Embedding weight init: uniform(-1/num_embeddings, 1/num_embeddings)
    embedding = jax.random.uniform(
        k_e, (num_embeddings, embed_dim), dtype=jnp.float32,
        minval=-1.0 / num_embeddings, maxval=1.0 / num_embeddings)

    z_q, emb_loss, com_loss = vector_quantizer_forward(z_e, embedding)
    jax.block_until_ready((z_q, emb_loss, com_loss))

    # Lightweight sanity check against a pure-JAX reference.
    z_flat = jnp.transpose(z_e, (0, 2, 3, 1)).reshape(-1, embed_dim)
    d2 = (jnp.sum(z_flat**2, -1, keepdims=True)
          - 2.0 * z_flat @ embedding.T
          + jnp.sum(embedding**2, -1)[None, :])
    idx = jnp.argmin(d2, axis=-1)
    zq_ref = jnp.transpose(embedding[idx].reshape(N, H, W, embed_dim), (0, 3, 1, 2))
    assert jnp.allclose(z_q, zq_ref, atol=1e-5), "z_q mismatch"
    assert jnp.allclose(emb_loss, jnp.mean((z_e - zq_ref) ** 2), atol=1e-5), "loss mismatch"
    assert jnp.allclose(com_loss, emb_loss), "loss mismatch"

    print("KERNEL_OK")
</pallas_src>

<mosaic_0001>
module attributes {stable_mosaic.version = 11 : i64} {
  func.func @_vq_kernel(%arg0: i32, %arg1: i32, %arg2: memref<1x4x256xf32, #tpu.memory_space<vmem>>, %arg3: memref<32x4xf32, #tpu.memory_space<vmem>>, %arg4: memref<4x32xf32, #tpu.memory_space<vmem>>, %arg5: memref<32x1xf32, #tpu.memory_space<vmem>>, %arg6: memref<1x4x256xf32, #tpu.memory_space<vmem>>, %arg7: memref<1x1x8x128xf32, #tpu.memory_space<vmem>>) attributes {dimension_semantics = [#tpu.dimension_semantics<parallel>, #tpu.dimension_semantics<parallel>], iteration_bounds = array<i64: 2, 1>, scalar_prefetch = 0 : i64, scratch_operands = 0 : i64, tpu.core_type = #tpu.core_type<tc>, window_params = [{transform_indices = @transform_0, window_bounds = array<i64: 1, 4, 256>}, {pipeline_mode = #tpu.pipeline_mode<synchronous>, transform_indices = @transform_1, window_bounds = array<i64: 32, 4>}, {pipeline_mode = #tpu.pipeline_mode<synchronous>, transform_indices = @transform_2, window_bounds = array<i64: 4, 32>}, {pipeline_mode = #tpu.pipeline_mode<synchronous>, transform_indices = @transform_3, window_bounds = array<i64: 32, 1>}, {transform_indices = @transform_4, window_bounds = array<i64: 1, 4, 256>}, {transform_indices = @transform_5, window_bounds = array<i64: 1, 1, 8, 128>}]} {
    %c0 = arith.constant 0 : index
    %c0_0 = arith.constant 0 : index
    %0 = vector.load %arg3[%c0, %c0_0] : memref<32x4xf32, #tpu.memory_space<vmem>>, vector<32x4xf32>
    %c0_1 = arith.constant 0 : index
    %c0_2 = arith.constant 0 : index
    %1 = vector.load %arg4[%c0_1, %c0_2] : memref<4x32xf32, #tpu.memory_space<vmem>>, vector<4x32xf32>
    %c0_3 = arith.constant 0 : index
    %c0_4 = arith.constant 0 : index
    %2 = vector.load %arg5[%c0_3, %c0_4] : memref<32x1xf32, #tpu.memory_space<vmem>>, vector<32x1xf32>
    %3 = tpu.iota {dimensions = array<i32: 0>} : vector<32x1xi32>
    %cst = arith.constant 0.000000e+00 : f32
    %c0_i32 = arith.constant 0 : i32
    %c256_i32 = arith.constant 256 : i32
    %4 = arith.muli %c0_i32, %c256_i32 : i32
    %5 = tpu.assume_multiple %4, 256 : i32
    %c0_5 = arith.constant 0 : index
    %c0_6 = arith.constant 0 : index
    %6 = arith.index_cast %5 : i32 to index
    %7 = vector.load %arg2[%c0_5, %c0_6, %6] : memref<1x4x256xf32, #tpu.memory_space<vmem>>, vector<1x4x256xf32>
    %8 = vector.shape_cast %7 : vector<1x4x256xf32> to vector<4x256xf32>
    %9 = vector.extract_strided_slice %0 {offsets = [0, 0], sizes = [32, 1], strides = [1, 1]} : vector<32x4xf32> to vector<32x1xf32>
    %10 = vector.extract_strided_slice %8 {offsets = [0, 0], sizes = [1, 256], strides = [1, 1]} : vector<4x256xf32> to vector<1x256xf32>
    %11 = vector.broadcast %9 : vector<32x1xf32> to vector<32x256xf32>
    %12 = vector.broadcast %10 : vector<1x256xf32> to vector<32x256xf32>
    %13 = arith.mulf %11, %12 : vector<32x256xf32>
    %14 = vector.extract_strided_slice %0 {offsets = [0, 1], sizes = [32, 1], strides = [1, 1]} : vector<32x4xf32> to vector<32x1xf32>
    %15 = vector.extract_strided_slice %8 {offsets = [1, 0], sizes = [1, 256], strides = [1, 1]} : vector<4x256xf32> to vector<1x256xf32>
    %16 = vector.broadcast %14 : vector<32x1xf32> to vector<32x256xf32>
    %17 = vector.broadcast %15 : vector<1x256xf32> to vector<32x256xf32>
    %18 = arith.mulf %16, %17 : vector<32x256xf32>
    %19 = arith.addf %13, %18 : vector<32x256xf32>
    %20 = vector.extract_strided_slice %0 {offsets = [0, 2], sizes = [32, 1], strides = [1, 1]} : vector<32x4xf32> to vector<32x1xf32>
    %21 = vector.extract_strided_slice %8 {offsets = [2, 0], sizes = [1, 256], strides = [1, 1]} : vector<4x256xf32> to vector<1x256xf32>
    %22 = vector.broadcast %20 : vector<32x1xf32> to vector<32x256xf32>
    %23 = vector.broadcast %21 : vector<1x256xf32> to vector<32x256xf32>
    %24 = arith.mulf %22, %23 : vector<32x256xf32>
    %25 = arith.addf %19, %24 : vector<32x256xf32>
    %26 = vector.extract_strided_slice %0 {offsets = [0, 3], sizes = [32, 1], strides = [1, 1]} : vector<32x4xf32> to vector<32x1xf32>
    %27 = vector.extract_strided_slice %8 {offsets = [3, 0], sizes = [1, 256], strides = [1, 1]} : vector<4x256xf32> to vector<1x256xf32>
    %28 = vector.broadcast %26 : vector<32x1xf32> to vector<32x256xf32>
    %29 = vector.broadcast %27 : vector<1x256xf32> to vector<32x256xf32>
    %30 = arith.mulf %28, %29 : vector<32x256xf32>
    %31 = arith.addf %25, %30 : vector<32x256xf32>
    %32 = vector.broadcast %2 : vector<32x1xf32> to vector<32x256xf32>
    %33 = arith.addf %31, %32 : vector<32x256xf32>
    %cst_7 = arith.constant dense<0x7F800000> : vector<256xf32>
    %34 = vector.multi_reduction <minimumf>, %33, %cst_7 [0] : vector<32x256xf32> to vector<256xf32>
    %35 = vector.shape_cast %34 : vector<256xf32> to vector<1x256xf32>
    %36 = vector.broadcast %35 : vector<1x256xf32> to vector<32x256xf32>
    %37 = arith.cmpf ole, %33, %36 : vector<32x256xf32>
    %c32_i32 = arith.constant 32 : i32
    %38 = vector.shape_cast %3 : vector<32x1xi32> to vector<32x1xi32>
    %39 = vector.broadcast %38 : vector<32x1xi32> to vector<32x256xi32>
    %40 = vector.broadcast %c32_i32 : i32 to vector<32x256xi32>
    %41 = arith.select %37, %39, %40 : vector<32x256xi1>, vector<32x256xi32>
    %cst_8 = arith.constant dense<2147483647> : vector<256xi32>
    %42 = vector.multi_reduction <minsi>, %41, %cst_8 [0] : vector<32x256xi32> to vector<256xi32>
    %43 = vector.shape_cast %42 : vector<256xi32> to vector<1x256xi32>
    %44 = vector.broadcast %3 : vector<32x1xi32> to vector<32x256xi32>
    %45 = vector.broadcast %43 : vector<1x256xi32> to vector<32x256xi32>
    %46 = arith.cmpi eq, %44, %45 : vector<32x256xi32>
    %47 = arith.extui %46 : vector<32x256xi1> to vector<32x256xi32>
    %48 = arith.sitofp %47 : vector<32x256xi32> to vector<32x256xf32>
    %cst_9 = arith.constant dense<0.000000e+00> : vector<4x256xf32>
    %49 = tpu.matmul %1, %48, %cst_9 {dimension_numbers = #tpu.dot_dimension_numbers<[1], [0], [0], [1], [0, 0, 1, 1], [], []>} : vector<4x32xf32>, vector<32x256xf32>, vector<4x256xf32> -> vector<4x256xf32>
    %c0_10 = arith.constant 0 : index
    %c0_11 = arith.constant 0 : index
    %50 = arith.index_cast %5 : i32 to index
    %51 = vector.load %arg6[%c0_10, %c0_11, %50] : memref<1x4x256xf32, #tpu.memory_space<vmem>>, vector<1x4x256xf32>
    %52 = vector.shape_cast %51 : vector<1x4x256xf32> to vector<4x256xf32>
    %53 = vector.shape_cast %49 : vector<4x256xf32> to vector<1x4x256xf32>
    tpu.vector_store %arg6[%c0_10, %c0_11, %50], %53 {strides = array<i32>} : memref<1x4x256xf32, #tpu.memory_space<vmem>>, vector<1x4x256xf32>,
    %54 = arith.subf %8, %49 : vector<4x256xf32>
    %55 = arith.mulf %54, %54 : vector<4x256xf32>
    %56 = vector.shape_cast %55 : vector<4x256xf32> to vector<1x4x256xf32>
    %cst_12 = arith.constant dense<0.000000e+00> : vector<1xf32>
    %57 = vector.multi_reduction <add>, %56, %cst_12 [1, 2] : vector<1x4x256xf32> to vector<1xf32>
    %58 = vector.shape_cast %57 : vector<1xf32> to vector<1x1x1xf32>
    %59 = vector.extract %58[0, 0, 0] : f32 from vector<1x1x1xf32>
    %60 = arith.addf %cst, %59 : f32
    %c1_i32 = arith.constant 1 : i32
    %61 = vector.broadcast %60 : f32 to vector<8x128xf32>
    %c0_13 = arith.constant 0 : index
    %c0_14 = arith.constant 0 : index
    %c0_15 = arith.constant 0 : index
    %c0_16 = arith.constant 0 : index
    %62 = vector.load %arg7[%c0_13, %c0_14, %c0_15, %c0_16] : memref<1x1x8x128xf32, #tpu.memory_space<vmem>>, vector<1x1x8x128xf32>
    %63 = vector.shape_cast %62 : vector<1x1x8x128xf32> to vector<8x128xf32>
    %64 = vector.shape_cast %61 : vector<8x128xf32> to vector<1x1x8x128xf32>
    tpu.vector_store %arg7[%c0_13, %c0_14, %c0_15, %c0_16], %64 {strides = array<i32>} : memref<1x1x8x128xf32, #tpu.memory_space<vmem>>, vector<1x1x8x128xf32>,
    return
  }
  func.func @transform_0(%arg0: i32, %arg1: i32) -> (i32, i32, i32) {
    %c0_i32 = arith.constant 0 : i32
    %c0_i32_0 = arith.constant 0 : i32
    return %arg0, %c0_i32, %arg1 : i32, i32, i32
  }
  func.func @transform_1(%arg0: i32, %arg1: i32) -> (i32, i32) {
    %c0_i32 = arith.constant 0 : i32
    %c0_i32_0 = arith.constant 0 : i32
    %c0_i32_1 = arith.constant 0 : i32
    return %c0_i32, %c0_i32_0 : i32, i32
  }
  func.func @transform_2(%arg0: i32, %arg1: i32) -> (i32, i32) {
    %c0_i32 = arith.constant 0 : i32
    %c0_i32_0 = arith.constant 0 : i32
    %c0_i32_1 = arith.constant 0 : i32
    return %c0_i32, %c0_i32_0 : i32, i32
  }
  func.func @transform_3(%arg0: i32, %arg1: i32) -> (i32, i32) {
    %c0_i32 = arith.constant 0 : i32
    %c0_i32_0 = arith.constant 0 : i32
    %c0_i32_1 = arith.constant 0 : i32
    return %c0_i32, %c0_i32_0 : i32, i32
  }
  func.func @transform_4(%arg0: i32, %arg1: i32) -> (i32, i32, i32) {
    %c0_i32 = arith.constant 0 : i32
    %c0_i32_0 = arith.constant 0 : i32
    return %arg0, %c0_i32, %arg1 : i32, i32, i32
  }
  func.func @transform_5(%arg0: i32, %arg1: i32) -> (i32, i32, i32, i32) {
    %c0_i32 = arith.constant 0 : i32
    %c0_i32_0 = arith.constant 0 : i32
    %c0_i32_1 = arith.constant 0 : i32
    return %arg0, %arg1, %c0_i32, %c0_i32_0 : i32, i32, i32, i32
  }
}

</mosaic_0001>

<bundles_post_ra>
// kernel: vector_quantizer_forward.1
= control target key start
LH: loop header
LB: loop body
LE: loop exit
PB: predicated region body
PF: predicated region fallthrough
CT: control target
= control target key end

     0   :  { %s981_s18 = smov 0   ;;  %s983_s19 = smov 0   ;;  %s1091_s0 = inlined_call_operand.vmem [shape: f32[2,4,256], index: 0, kind: input, shape index: {}]   ;;  %s1092_s1 = inlined_call_operand.vmem [shape: f32[32,4], index: 1, kind: input, shape index: {}]   ;;  %s1093_s2 = inlined_call_operand.vmem [shape: f32[4,32], index: 2, kind: input, shape index: {}]   ;;  %s1094_s3 = inlined_call_operand.vmem [shape: f32[32,1], index: 3, kind: input, shape index: {}]   ;;  %s1095_s4 = inlined_call_operand.vmem [shape: f32[2,4,256], index: 4, kind: output, shape index: {0}]   ;;  %s1096_s5 = inlined_call_operand.vmem [shape: f32[2,1,8,128], index: 5, kind: output, shape index: {1}]  }
   0x1   :  { %s985_s20 = smov 0  }
   0x2 LB: > { %s28_s21 = sadd.s32 1, %s939_s19  ;;  %p844_p0 = scmp.ge.s32.totalorder %s943_s20, 1  ;;  %s943_s20 = sphi %s985_s20, %s16_s20   ;;  %s939_s19 = sphi %s983_s19, %s1098_s19   ;;  %s935_s18 = sphi %s981_s18, %s1097_s18  }
   0x3   : > { %p30_p1 = scmp.ge.s32.totalorder %s28_s21, 2  ;;  %p213_p2 = scmp.lt.s32.totalorder %s943_s20, 3 }
   0x5   : > { %s1100_s21 = smov (%p30_p1, %s28_s21), 0  ;;  %p214_p3 = pnand %p844_p0, %p213_p2 }
   0x6   : > { %v285_v0 = vld [vmem:[%s1092_s1 + $0x10] sm:$0xff] (!%p214_p3)  ;;  %v283_v1 = vld [vmem:[%s1092_s1] sm:$0xff] (!%p214_p3)  ;;  %v945_v2 = vmov (!%p214_p3), 0   ;;  %v286_v3 = vld [vmem:[%s1092_s1 + $0x18] sm:$0xff] (!%p214_p3)  ;;  %v946_v5 = vmov (!%p214_p3), 1   ;;  %v947_v6 = vmov (!%p214_p3), 2   ;;  %v292_v19 = vlaneseq (!%p214_p3) }
   0x7   : > { %217 = sbr.rel (%p214_p3) target bundleno = 662 (0x296), region = 36  ;;  %912 = vset.pattern.permute.xlu1 (!%p214_p3), %v945_v2  ;;  %911 = vset.pattern.permute.xlu0 (!%p214_p3), %v945_v2  ;;  %v284_v4 = vld [vmem:[%s1092_s1 + $0x8] sm:$0xff] (!%p214_p3)  ;;  %v948_v7 = vmov (!%p214_p3), 3   ;;  %v288_v9 = vld [vmem:[%s1094_s3] sm:$0xff] (!%p214_p3)  ;;  %v290_v10 = vld [vmem:[%s1094_s3 + $0x10] sm:$0xff] (!%p214_p3)  ;;  %v949_v12 = vmov (!%p214_p3), 0.0  }
   0x8   : > { %310 = vperm.xlu1 (!%p214_p3), %912, %v285_v0   ;;  %300 = vperm.xlu0 (!%p214_p3), %911, %v283_v1   ;;  %v289_v8 = vld [vmem:[%s1094_s3 + $0x8] sm:$0xff] (!%p214_p3)  ;;  %v291_v11 = vld [vmem:[%s1094_s3 + $0x18] sm:$0xff] (!%p214_p3)  ;;  %p257_p4 = scmp.lt.s32.totalorder (!%p214_p3), %s935_s18, 1  ;;  %v1029_v21 = vshrl.u32 (!%p214_p3), %v292_v19, 7 }
   0x9   : > { %679 = vmatprep.mubr.f32.mxu0 (!%p214_p3), %v949_v12 }
   0xa   : > { %v363_v23 = vsub.s32 (!%p214_p3), 1, %v1029_v21  ;;  %v367_v24 = vsub.s32 (!%p214_p3), 5, %v1029_v21  ;;  %v321_v25 = vsub.s32 (!%p214_p3), 0, %v1029_v21  ;;  %v325_v26 = vsub.s32 (!%p214_p3), 4, %v1029_v21 }
   0xb   : > { %v413_v30 = vsub.s32 (!%p214_p3), 2, %v1029_v21  ;;  %v417_v31 = vsub.s32 (!%p214_p3), 6, %v1029_v21  ;;  %v463_v36 = vsub.s32 (!%p214_p3), 3, %v1029_v21  ;;  %v467_v37 = vsub.s32 (!%p214_p3), 7, %v1029_v21 }
   0xc   : > { %315 = vperm.xlu1 (!%p214_p3), %912, %v286_v3   ;;  %305 = vperm.xlu0 (!%p214_p3), %911, %v284_v4  }
   0xe   : > { %s1102_s18 = smov (!%p257_p4, %s935_s18), 1 }
   0xf   : > { %s1027_s13 = sshll.u32 %s1102_s18, 3 }
  0x10   : > { %914 = vset.pattern.permute.xlu1 %v946_v5  ;;  %913 = vset.pattern.permute.xlu0 %v946_v5  ;;  %s264_s16 = scalar_lea.vmem %s1091_s0, %s1027_s13  ;;  %s274_s24 = scalar_lea.vmem %s1095_s4, %s1027_s13 }
  0x11   : > { %350 = vperm.xlu1 %914, %v284_v4   ;;  %346 = vperm.xlu0 %913, %v283_v1   ;;  %v1041_v29 = vld [vmem:[%s264_s16] sm:$0xff]  ;;  %s282_s27 = scalar_lea.vmem %s1096_s5, %s1027_s13 }
  0x12   : > { %v364_v32 = vrot.slane %v1041_v29, %v363_v23  ;;  %v368_v33 = vrot.slane %v1041_v29, %v367_v24  ;;  %v322_v34 = vrot.slane %v1041_v29, %v321_v25  ;;  %v326_v35 = vrot.slane %v1041_v29, %v325_v26 }
  0x13   : > { %v414_v39 = vrot.slane %v1041_v29, %v413_v30  ;;  %v418_v40 = vrot.slane %v1041_v29, %v417_v31  ;;  %v464_v46 = vrot.slane %v1041_v29, %v463_v36  ;;  %v468_v47 = vrot.slane %v1041_v29, %v467_v37 }
  0x14   : > { %v374_v41 = vrot.slane %v364_v32, %v363_v23  ;;  %v378_v42 = vrot.slane %v368_v33, %v363_v23  ;;  %v332_v44 = vrot.slane %v322_v34, %v321_v25  ;;  %v336_v45 = vrot.slane %v326_v35, %v321_v25 }
  0x15   : > { %354 = vperm.xlu1 %914, %v285_v0   ;;  %358 = vperm.xlu0 %913, %v286_v3   ;;  %v424_v48 = vrot.slane %v414_v39, %v413_v30  ;;  %v428_v49 = vrot.slane %v418_v40, %v413_v30  ;;  %v474_v62 = vrot.slane %v464_v46, %v463_v36 }
  0x16   : > { %v478_v63 = vrot.slane %v468_v47, %v463_v36 }
  0x19   : > { %915 = vset.pattern.permute.xlu1 %v947_v6  ;;  %916 = vset.pattern.permute.xlu0 %v947_v6 }
  0x1a   : > { %396 = vperm.xlu1 %915, %v283_v1   ;;  %400 = vperm.xlu0 %916, %v284_v4  }
  0x1e   : > { %404 = vperm.xlu1 %915, %v285_v0   ;;  %917 = vset.pattern.permute.xlu0 %v948_v7 }
  0x1f   : > { %446 = vperm.xlu0 %917, %v283_v1  }
  0x22   : > { %408 = vperm.xlu1 %915, %v286_v3  }
  0x23   : > { %458 = vperm.xlu0 %917, %v286_v3  }
  0x26   : > { %918 = vset.pattern.permute.xlu1 %v948_v7 }
  0x27   : > { %450 = vperm.xlu1 %918, %v284_v4   ;;  %920 = vset.pattern.permute.xlu0 %v945_v2 }
  0x28   : > { %502 = vperm.xlu0 %920, %v289_v8  }
  0x2b   : > { %454 = vperm.xlu1 %918, %v285_v0  }
  0x2f   : > { %919 = vset.pattern.permute.xlu1 %v945_v2 }
  0x30   : > { %497 = vperm.xlu1 %919, %v288_v9  }
  0x34   : > { %507 = vperm.xlu1 %919, %v290_v10  }
  0x38   : > { %512 = vperm.xlu1 %919, %v291_v11  }
  0x87   : > { %v311_v13 = vpop.permute.xlu1 %310  ;;  %v301_v14 = vpop.permute.xlu0 %300 }
  0x88   : > { %v337_v55 = vmul.f32 %v332_v44, %v301_v14  ;;  %v338_v56 = vmul.f32 %v336_v45, %v301_v14  ;;  %v341_v0 = vmul.f32 %v332_v44, %v311_v13  ;;  %v342_v1 = vmul.f32 %v336_v45, %v311_v13 }
  0x8b   : > { %v316_v15 = vpop.permute.xlu1 %315  ;;  %v306_v17 = vpop.permute.xlu0 %305 }
  0x8c   : > { %v339_v51 = vmul.f32 %v332_v44, %v306_v17  ;;  %v340_v52 = vmul.f32 %v336_v45, %v306_v17  ;;  %v343_v5 = vmul.f32 %v332_v44, %v316_v15  ;;  %v344_v6 = vmul.f32 %v336_v45, %v316_v15 }
  0x90   : > { %v351_v16 = vpop.permute.xlu1 %350  ;;  %v347_v20 = vpop.permute.xlu0 %346 }
  0x91   : > { %v381_v53 = vmul.f32 %v374_v41, %v351_v16  ;;  %v382_v54 = vmul.f32 %v378_v42, %v351_v16  ;;  %v379_v57 = vmul.f32 %v374_v41, %v347_v20  ;;  %v380_v58 = vmul.f32 %v378_v42, %v347_v20 }
  0x93   : > { %v389_v7 = vadd.f32 %v381_v53, %v339_v51  ;;  %v390_v8 = vadd.f32 %v382_v54, %v340_v52  ;;  %v387_v9 = vadd.f32 %v379_v57, %v337_v55  ;;  %v388_v10 = vadd.f32 %v380_v58, %v338_v56 }
  0x94   : > { %v355_v18 = vpop.permute.xlu1 %354  ;;  %v359_v27 = vpop.permute.xlu0 %358 }
  0x95   : > { %v383_v59 = vmul.f32 %v374_v41, %v355_v18  ;;  %v384_v60 = vmul.f32 %v378_v42, %v355_v18  ;;  %v385_v2 = vmul.f32 %v374_v41, %v359_v27  ;;  %v386_v3 = vmul.f32 %v378_v42, %v359_v27 }
  0x97   : > { %v391_v14 = vadd.f32 %v383_v59, %v341_v0  ;;  %v392_v16 = vadd.f32 %v384_v60, %v342_v1  ;;  %v393_v19 = vadd.f32 %v385_v2, %v343_v5  ;;  %v394_v20 = vadd.f32 %v386_v3, %v344_v6 }
  0x99   : > { %v1031_v22 = vpop.permute.xlu1 %396  ;;  %v401_v43 = vpop.permute.xlu0 %400 }
  0x9a   : > { %v431_v11 = vmul.f32 %v424_v48, %v401_v43  ;;  %v432_v12 = vmul.f32 %v428_v49, %v401_v43  ;;  %v429_v13 = vmul.f32 %v424_v48, %v1031_v22  ;;  %v430_v25 = vmul.f32 %v428_v49, %v1031_v22 }
  0x9c   : > { %v439_v31 = vadd.f32 %v431_v11, %v389_v7  ;;  %v440_v32 = vadd.f32 %v432_v12, %v390_v8  ;;  %v437_v42 = vadd.f32 %v429_v13, %v387_v9  ;;  %v438_v43 = vadd.f32 %v430_v25, %v388_v10 }
  0x9d   : > { %v405_v28 = vpop.permute.xlu1 %404 }
  0x9e   : > { %v447_v61 = vpop.permute.xlu0 %446  ;;  %v433_v17 = vmul.f32 %v424_v48, %v405_v28  ;;  %v434_v18 = vmul.f32 %v428_v49, %v405_v28 }
  0x9f   : > { %v479_v37 = vmul.f32 %v474_v62, %v447_v61  ;;  %v480_v28 = vmul.f32 %v478_v63, %v447_v61 }
  0xa0   : > { %v441_v35 = vadd.f32 %v433_v17, %v391_v14  ;;  %v442_v36 = vadd.f32 %v434_v18, %v392_v16  ;;  %v294_v16 = vadd.s32 8, %v1029_v21 }
  0xa1   : > { %v409_v38 = vpop.permute.xlu1 %408 }
  0xa2   : > { %v435_v23 = vmul.f32 %v424_v48, %v409_v38  ;;  %v436_v24 = vmul.f32 %v428_v49, %v409_v38  ;;  %v459_v26 = vpop.permute.xlu0 %458  ;;  %v487_v49 = vadd.f32 %v479_v37, %v437_v42 }
  0xa3   : > { %v485_v41 = vmul.f32 %v474_v62, %v459_v26  ;;  %v486_v38 = vmul.f32 %v478_v63, %v459_v26 }
  0xa4   : > { %v443_v39 = vadd.f32 %v435_v23, %v393_v19  ;;  %v444_v40 = vadd.f32 %v436_v24, %v394_v20  ;;  %v1059_v19 = vadd.s32 16, %v1029_v21  ;;  %v296_v20 = vadd.s32 24, %v1029_v21 }
  0xa6   : > { %v451_v50 = vpop.permute.xlu1 %450  ;;  %v493_v53 = vadd.f32 %v485_v41, %v443_v39  ;;  %v494_v54 = vadd.f32 %v486_v38, %v444_v40 }
  0xa7   : > { %v481_v15 = vmul.f32 %v474_v62, %v451_v50  ;;  %v482_v27 = vmul.f32 %v478_v63, %v451_v50  ;;  %v503_v46 = vpop.permute.xlu0 %502  ;;  %v488_v50 = vadd.f32 %v480_v28, %v438_v43 }
  0xa9   : > { %v489_v44 = vadd.f32 %v481_v15, %v439_v31  ;;  %v490_v22 = vadd.f32 %v482_v27, %v440_v32 }
  0xaa   : > { %v455_v4 = vpop.permute.xlu1 %454 }
  0xab   : > { %v483_v33 = vmul.f32 %v474_v62, %v455_v4  ;;  %v484_v34 = vmul.f32 %v478_v63, %v455_v4  ;;  %v517_v55 = vadd.f32 %v503_v46, %v489_v44  ;;  %v518_v56 = vadd.f32 %v503_v46, %v490_v22 }
  0xad   : > { %v491_v47 = vadd.f32 %v483_v33, %v441_v35  ;;  %v492_v48 = vadd.f32 %v484_v34, %v442_v36 }
  0xaf   : > { %v498_v30 = vpop.permute.xlu1 %497 }
  0xb0   : > { %v515_v58 = vadd.f32 %v498_v30, %v487_v49  ;;  %v516_v59 = vadd.f32 %v498_v30, %v488_v50 }
  0xb3   : > { %v508_v45 = vpop.permute.xlu1 %507 }
  0xb4   : > { %v519_v51 = vadd.f32 %v508_v45, %v491_v47  ;;  %v520_v52 = vadd.f32 %v508_v45, %v492_v48  ;;  %v950_v47 = vmov 1.0|1.0  }
  0xb6   : > { %v523_v62 = vmin.f32 %v515_v58, %v519_v51  ;;  %v532_v63 = vmin.f32 %v516_v59, %v520_v52 }
  0xb7   : > { %v513_v57 = vpop.permute.xlu1 %512 }
  0xb8   : > { %v521_v60 = vadd.f32 %v513_v57, %v493_v53  ;;  %v522_v61 = vadd.f32 %v513_v57, %v494_v54 }
  0xba   : > { %v524_v0 = vmin.f32 %v517_v55, %v521_v60  ;;  %v533_v1 = vmin.f32 %v518_v56, %v522_v61 }
  0xbc   : > { %v525_v2 = vmin.f32 %v523_v62, %v524_v0  ;;  %v534_v3 = vmin.f32 %v532_v63, %v533_v1 }
  0xbe   : > { %v526_v4 = vrot.slane %v525_v2, 4  ;;  %v535_v5 = vrot.slane %v534_v3, 4 }
  0xc0   : > { %v527_v6 = vmin.f32 %v525_v2, %v526_v4  ;;  %v536_v7 = vmin.f32 %v534_v3, %v535_v5 }
  0xc2   : > { %v528_v8 = vrot.slane %v527_v6, 2  ;;  %v537_v9 = vrot.slane %v536_v7, 2 }
  0xc4   : > { %v529_v10 = vmin.f32 %v527_v6, %v528_v8  ;;  %v538_v11 = vmin.f32 %v536_v7, %v537_v9 }
  0xc6   : > { %v530_v12 = vrot.slane %v529_v10, 1  ;;  %v539_v14 = vrot.slane %v538_v11, 1 }
  0xc8   : > { %v531_v17 = vmin.f32 %v529_v10, %v530_v12  ;;  %v540_v18 = vmin.f32 %v538_v11, %v539_v14 }
  0xca   : > { %vm541_vm0 = vcmp.le.f32.partialorder %v515_v58, %v531_v17  ;;  %vm542_vm1 = vcmp.le.f32.partialorder %v516_v59, %v540_v18  ;;  %vm543_vm2 = vcmp.le.f32.partialorder %v517_v55, %v531_v17  ;;  %vm544_vm3 = vcmp.le.f32.partialorder %v518_v56, %v540_v18 }
  0xcb   : > { %vm545_vm4 = vcmp.le.f32.partialorder %v519_v51, %v531_v17  ;;  %vm546_vm5 = vcmp.le.f32.partialorder %v520_v52, %v540_v18  ;;  %vm547_vm6 = vcmp.le.f32.partialorder %v521_v60, %v531_v17  ;;  %vm548_vm7 = vcmp.le.f32.partialorder %v522_v61, %v540_v18 }
  0xcc   : > { %v549_v23 = vsel %vm541_vm0, %v1029_v21, 32  ;;  %v550_v24 = vsel %vm542_vm1, %v1029_v21, 32  ;;  %v551_v13 = vsel %vm543_vm2, %v294_v16, 32  ;;  %v552_v25 = vsel %vm544_vm3, %v294_v16, 32 }
  0xcd   : > { %v553_v26 = vsel %vm545_vm4, %v1059_v19, 32  ;;  %v554_v15 = vsel %vm546_vm5, %v1059_v19, 32  ;;  %v555_v27 = vsel %vm547_vm6, %v296_v20, 32  ;;  %v556_v30 = vsel %vm548_vm7, %v296_v20, 32 }
  0xce   : > { %vm557_vm8 = vcmp.lt.s32.totalorder %v549_v23, %v553_v26  ;;  %vm559_vm9 = vcmp.lt.s32.totalorder %v551_v13, %v555_v27  ;;  %vm572_vm10 = vcmp.lt.s32.totalorder %v550_v24, %v554_v15  ;;  %vm574_vm11 = vcmp.lt.s32.totalorder %v552_v25, %v556_v30 }
  0xcf   : > { %v558_v31 = vsel %vm557_vm8, %v549_v23, %v553_v26  ;;  %v560_v32 = vsel %vm559_vm9, %v551_v13, %v555_v27  ;;  %v573_v33 = vsel %vm572_vm10, %v550_v24, %v554_v15  ;;  %v575_v34 = vsel %vm574_vm11, %v552_v25, %v556_v30 }
  0xd0   : > { %vm561_vm12 = vcmp.lt.s32.totalorder %v558_v31, %v560_v32  ;;  %vm576_vm13 = vcmp.lt.s32.totalorder %v573_v33, %v575_v34 }
  0xd1   : > { %v562_v35 = vsel %vm561_vm12, %v558_v31, %v560_v32  ;;  %v577_v36 = vsel %vm576_vm13, %v573_v33, %v575_v34 }
  0xd2   : > { %v563_v37 = vrot.slane %v562_v35, 4  ;;  %v578_v28 = vrot.slane %v577_v36, 4 }
  0xd4   : > { %vm564_vm14 = vcmp.lt.s32.totalorder %v562_v35, %v563_v37  ;;  %vm579_vm15 = vcmp.lt.s32.totalorder %v577_v36, %v578_v28 }
  0xd5   : > { %v565_v39 = vsel %vm564_vm14, %v562_v35, %v563_v37  ;;  %v580_v40 = vsel %vm579_vm15, %v577_v36, %v578_v28 }
  0xd6   : > { %v566_v41 = vrot.slane %v565_v39, 2  ;;  %v581_v38 = vrot.slane %v580_v40, 2 }
  0xd8   : > { %vm582_vm0 = vcmp.lt.s32.totalorder %v580_v40, %v581_v38  ;;  %vm567_vm1 = vcmp.lt.s32.totalorder %v565_v39, %v566_v41 }
  0xd9   : > { %v583_v42 = vsel %vm582_vm0, %v580_v40, %v581_v38  ;;  %v568_v43 = vsel %vm567_vm1, %v565_v39, %v566_v41  ;;  %vm611_vm0 = vcmask 261120   ;;  %vm696_vm1 = vcmask 1043456  }
  0xda   : > { %v584_v44 = vrot.slane %v583_v42, 1  ;;  %v569_v22 = vrot.slane %v568_v43, 1 }
  0xdc   : > { %vm585_vm2 = vcmp.lt.s32.totalorder %v583_v42, %v584_v44  ;;  %vm570_vm3 = vcmp.lt.s32.totalorder %v568_v43, %v569_v22 }
  0xdd   : > { %v586_v45 = vsel %vm585_vm2, %v583_v42, %v584_v44  ;;  %v571_v46 = vsel %vm570_vm3, %v568_v43, %v569_v22 }
  0xde   : > { %vm588_vm4 = vcmp.eq.s32.totalorder %v1029_v21, %v586_v45  ;;  %vm590_vm5 = vcmp.eq.s32.totalorder %v294_v16, %v586_v45  ;;  %vm587_vm6 = vcmp.eq.s32.totalorder %v1029_v21, %v571_v46  ;;  %vm589_vm7 = vcmp.eq.s32.totalorder %v294_v16, %v571_v46  ;;  %v287_v21 = vld [vmem:[%s1093_s2] sm:$0xf] }
  0xdf   : > { %vm871_vm8 = vmpackc.low %vm590_vm5, %vm588_vm4  ;;  %vm592_vm9 = vcmp.eq.s32.totalorder %v1059_v19, %v586_v45  ;;  %vm594_vm10 = vcmp.eq.s32.totalorder %v296_v20, %v586_v45  ;;  %vm591_vm13 = vcmp.eq.s32.totalorder %v1059_v19, %v571_v46  ;;  %vm593_vm14 = vcmp.eq.s32.totalorder %v296_v20, %v571_v46 }
  0xe0   : > { %872 = vmatprep.subr.msk.bf16.mxu0 %vm871_vm8, %v950_v47  ;;  %vm873_vm11 = vmpackc.low %vm589_vm7, %vm587_vm6 }
  0xe1   : > { %874 = vmatpush1.bf16.msk.msra.mxu0 %vm873_vm11, %v950_v47  ;;  %vm875_vm12 = vmpackc.low %vm594_vm10, %vm592_vm9 }
  0xe2   : > { %876 = vmatprep.subr.msk.bf16.mxu0 %vm875_vm12, %v950_v47  ;;  %vm877_vm15 = vmpackc.low %vm593_vm14, %vm591_vm13 }
  0xe5   : > { %878 = vmatpush1.bf16.msk.msra.mxu0 %vm877_vm15, %v950_v47 }
  0xe8   : > { %866 = vmatmul.mubr.msk.f32.vlgmr.msra.gmra.mrb[0].mxu0 %vm611_vm0, %v287_v21 }
 0x1bb   : > { %v681_v48 = vpop.f32.mrb[0].mxu0 }
 0x1bc   : > { %v683_v49 = vpop.f32.mrb[1].mxu0 }
 0x1bd   : > { %v688_v50 = vcombine.low %v681_v48, %v683_v49 }
 0x1bf   : > { %690 = vst [vmem:[%s274_s24] sm:$0xff] %v688_v50  ;;  %v691_v51 = vsub.f32 %v1041_v29, %v688_v50 }
 0x1c1   : > { %v692_v52 = vmul.f32 %v691_v51, %v691_v51 }
 0x1c3   : > { %v694_v53 = vcombine.high %v692_v52, %v692_v52  ;;  %v697_v54 = vsel %vm696_vm1, %v692_v52, 0.0 }
 0x1c5   : > { %v698_v55 = vsel %vm696_vm1, %v694_v53, 0.0 }
 0x1c6   : > { %v699_v56 = vadd.f32 %v698_v55, %v697_v54 }
 0x1c8   : > { %700 = vadd.xlane.f32.xlu0 %v699_v56 }
 0x255   : > { %v701_v57 = vpop.xlane.xlu0 %700 }
 0x256   : > { %v702_v58 = vrot.slane %v701_v57, 4 }
 0x258   : > { %v703_v59 = vadd.f32 %v702_v58, %v701_v57 }
 0x25a   : > { %v704_v60 = vrot.slane %v703_v59, 2 }
 0x25c   : > { %v705_v61 = vadd.f32 %v704_v60, %v703_v59 }
 0x25e   : > { %v706_v62 = vrot.slane %v705_v61, 1 }
 0x260   : > { %v707_v63 = vadd.f32 %v706_v62, %v705_v61 }
 0x262   : > { %879 = vpush %v707_v63 }
 0x293   : > { %s880_s28 = spop %879 }
 0x294   : > { %v710_v29 = vstv %s880_s28 }
 0x295   : > { %711 = vst [vmem:[%s282_s27] sm:$0xff] %v710_v29 }
 0x296 PF: > { %s16_s20 = sadd.s32 1, %s943_s20   ;;  %s1097_s18 = smov %s939_s19 }
 0x297   : > { %p13_p5 = scmp.ge.s32.totalorder %s16_s20, 4   ;;  %s1098_s19 = smov %s1100_s21 }
 0x299   :  { %15 = sbr.rel (!%p13_p5) target bundleno = 2 (0x2), region = 78 }

</bundles_post_ra>
